<compile_context>
chip_gen: v5e
topology: v5e:2x2
jax: 0.10.0
libtpu: 0.0.40
codegen_flags: <defaults>
</compile_context>

<pallas_src>
import math

import jax
import jax.numpy as jnp
from jax.experimental import pallas as pl
from jax.experimental.pallas import tpu as pltpu


def _round_up(x, m):
    return ((x + m - 1) // m) * m


def combine_uv_kernel(x_ref, wt_ref, vt_ref, ga_ref, gb_ref, bias_ref, out_ref):
    """Computes one (tb, tl) output tile.

    x_ref   : (tb, D)   input rows
    wt_ref  : (D, tl)   refinement classifiers, pre-transposed (K-major)
    vt_ref  : (D, tl)   label embeddings,       pre-transposed (K-major)
    ga_ref  : (D, 1)    sigmoid(alpha), precomputed in the wrapper
    gb_ref  : (D, 1)    sigmoid(beta),  precomputed in the wrapper
    bias_ref: (1, tl)   per-label bias (f32)
    out_ref : (tb, tl)
    """
    # Gated combine in (D, tl) layout -> MXU consumes it as a natural (K, N) RHS
    # with no transpose in the hot loop.
    clf = ga_ref[...] * wt_ref[...] + gb_ref[...] * vt_ref[...]
    acc = jnp.dot(x_ref[...].astype(clf.dtype), clf,
                  preferred_element_type=jnp.float32)            # f32 accumulate
    out_ref[...] = (acc + bias_ref[...]).astype(out_ref.dtype)   # bias add in f32


def combine_uv_forward(x, labels, weight, alpha, beta, bias, *,
                       tl=None, tb=None, param_dtype=None,
                       vmem_budget_bytes=40 << 20):
    """F.linear(x, sigmoid(alpha)*weight + sigmoid(beta)*labels, bias).

    x: (B, D); labels, weight: (L, D); alpha, beta: (1, D); bias: (L,) or (1, L).
    Returns (B, L) in x.dtype.
    """
    B, D = x.shape
    L, D2 = labels.shape
    assert weight.shape == (L, D) and D2 == D
    bias2d = bias.reshape(1, L).astype(jnp.float32)

    # --- Layout prep (cheap (1,D)/(L,D) ops; in production, persist the
    # classifier tensors in this (D, L) K-major layout / bf16 once at load). ---
    gate_a = jax.nn.sigmoid(alpha).reshape(D, 1)   # hoisted out of the grid loop
    gate_b = jax.nn.sigmoid(beta).reshape(D, 1)
    w_t = weight.T                                 # (D, L)
    v_t = labels.T                                 # (D, L)
    if param_dtype is not None:                    # optional bf16 weight traffic
        w_t = w_t.astype(param_dtype)
        v_t = v_t.astype(param_dtype)
        gate_a = gate_a.astype(param_dtype)
        gate_b = gate_b.astype(param_dtype)
    p_bytes = w_t.dtype.itemsize
    x_bytes = x.dtype.itemsize

    # --- Tile selection (VMEM-budgeted; fits v7x's 64 MiB VMEM per TC). ---
    if tb is None:
        tb = min(_round_up(B, 8), 256)
    if tl is None:
        # Double-buffered (D, tl) weight + label tiles dominate the working set.
        per_tl = 4 * D * p_bytes + 2 * tb * 4
        budget = max(vmem_budget_bytes - 2 * tb * D * 4, per_tl * 256)
        tl = max(256, (budget // per_tl) // 256 * 256)   # multiple of 256 (v6e MXU)
        tl = min(tl, 2048)                               # diminishing returns past ~2k
    tl = min(tl, _round_up(L, 256))                      # don't over-pad tiny label sets

    Bp = _round_up(B, tb)
    Lp = _round_up(L, tl)

    # --- Zero-pad ragged edges (DECAF label counts are not tile multiples);
    # padded rows/cols only produce output that is sliced off below. ---
    xp = jnp.pad(x, ((0, Bp - B), (0, 0))) if Bp != B else x
    if Lp != L:
        w_t = jnp.pad(w_t, ((0, 0), (0, Lp - L)))
        v_t = jnp.pad(v_t, ((0, 0), (0, Lp - L)))
        bias2d = jnp.pad(bias2d, ((0, 0), (0, Lp - L)))

    n_l, n_b = Lp // tl, Bp // tb

    # Rough VMEM use (default double-buffering) -> explicit scoped-VMEM limit
    # (v5e default is 16 MiB; keep <= 56 MiB so v7x's 64 MiB VMEM has headroom).
    vmem_est = (4 * D * tl * p_bytes          # wT + vT tiles, 2 buffers each
                + 2 * tb * D * x_bytes        # x tile
                + 2 * tb * tl * x_bytes       # out tile
                + 2 * (2 * D * p_bytes + tl * 4))
    vmem_limit = int(min(max(vmem_est + (8 << 20), 32 << 20), 56 << 20))

    cost = pl.CostEstimate(
        flops=2 * Bp * Lp * D + 3 * Lp * D,
        transcendentals=0,
        bytes_accessed=(2 * Lp * D * p_bytes + Bp * D * x_bytes
                        + Bp * Lp * x_bytes + Lp * 4 + 2 * D * p_bytes),
    )

    out = pl.pallas_call(
        combine_uv_kernel,
        out_shape=jax.ShapeDtypeStruct((Bp, Lp), x.dtype),
        grid_spec=pltpu.PrefetchScalarGridSpec(
            num_scalar_prefetch=0,
            # L (labels) outer, B inner: the big (D, tl) classifier tiles keep
            # the same block index across the inner batch loop, so they are
            # streamed from HBM exactly once per label tile.
            grid=(n_l, n_b),
            in_specs=[
                pl.BlockSpec((tb, D), lambda l, b: (b, 0)),   # x rows
                pl.BlockSpec((D, tl), lambda l, b: (0, l)),   # weight^T tile
                pl.BlockSpec((D, tl), lambda l, b: (0, l)),   # labels^T tile
                pl.BlockSpec((D, 1), lambda l, b: (0, 0)),    # sigmoid(alpha)
                pl.BlockSpec((D, 1), lambda l, b: (0, 0)),    # sigmoid(beta)
                pl.BlockSpec((1, tl), lambda l, b: (0, l)),   # bias tile
            ],
            out_specs=pl.BlockSpec((tb, tl), lambda l, b: (b, l)),
        ),
        compiler_params=pltpu.CompilerParams(
            dimension_semantics=("parallel", "parallel"),  # v7x: shard over 2 TCs
            vmem_limit_bytes=vmem_limit,
        ),
        cost_estimate=cost,
    )(xp, w_t, v_t, gate_a, gate_b, bias2d)

    return out[:B, :L]


if __name__ == "__main__":
    # Small shapes consistent with the module: B=batch, D=input_size (embedding
    # dim), L=output_size (number of labels). B and L are deliberately NOT tile
    # multiples to exercise the padding path.
    B, D, L = 6, 128, 300
    key = jax.random.PRNGKey(0)
    kx, kv, kw, ka, kb, kbias = jax.random.split(key, 6)

    # Parameters. reset_parameters() would give uniform weight and zero
    # alpha/beta/bias; small random gates/bias are used to exercise every term.
    stdv = 1.0 / math.sqrt(D)
    weight = jax.random.uniform(kw, (L, D), jnp.float32, minval=-stdv, maxval=stdv)
    alpha = 0.1 * jax.random.normal(ka, (1, D), jnp.float32)
    beta = 0.1 * jax.random.normal(kb, (1, D), jnp.float32)
    bias = 0.1 * jax.random.normal(kbias, (L,), jnp.float32)

    # Forward inputs.
    x = jax.random.normal(kx, (B, D), jnp.float32)
    labels = jax.random.normal(kv, (L, D), jnp.float32)   # lbl_clf embeddings

    fwd = jax.jit(combine_uv_forward)
    out = jax.block_until_ready(fwd(x, labels, weight, alpha, beta, bias))

    # Pure-JAX reference: F.linear(input, sig(alpha)*W + sig(beta)*V, bias).
    clf_ref = jax.nn.sigmoid(alpha) * weight + jax.nn.sigmoid(beta) * labels
    ref = x @ clf_ref.T + bias[None, :]
    assert out.shape == (B, L)
    assert jnp.allclose(out, ref, atol=1e-4, rtol=1e-4), float(jnp.abs(out - ref).max())

    print("KERNEL_OK")
</pallas_src>

<mosaic_0001>
module attributes {stable_mosaic.version = 11 : i64} {
  func.func @combine_uv_kernel(%arg0: i32, %arg1: i32, %arg2: memref<8x128xf32, #tpu.memory_space<vmem>>, %arg3: memref<128x512xf32, #tpu.memory_space<vmem>>, %arg4: memref<128x512xf32, #tpu.memory_space<vmem>>, %arg5: memref<128x1xf32, #tpu.memory_space<vmem>>, %arg6: memref<128x1xf32, #tpu.memory_space<vmem>>, %arg7: memref<1x512xf32, #tpu.memory_space<vmem>>, %arg8: memref<8x512xf32, #tpu.memory_space<vmem>>) attributes {dimension_semantics = [#tpu.dimension_semantics<parallel>, #tpu.dimension_semantics<parallel>], iteration_bounds = array<i64: 1, 1>, scalar_prefetch = 0 : i64, scratch_operands = 0 : i64, tpu.core_type = #tpu.core_type<tc>, window_params = [{transform_indices = @transform_0, window_bounds = array<i64: 8, 128>}, {transform_indices = @transform_1, window_bounds = array<i64: 128, 512>}, {transform_indices = @transform_2, window_bounds = array<i64: 128, 512>}, {pipeline_mode = #tpu.pipeline_mode<synchronous>, transform_indices = @transform_3, window_bounds = array<i64: 128, 1>}, {pipeline_mode = #tpu.pipeline_mode<synchronous>, transform_indices = @transform_4, window_bounds = array<i64: 128, 1>}, {transform_indices = @transform_5, window_bounds = array<i64: 1, 512>}, {transform_indices = @transform_6, window_bounds = array<i64: 8, 512>}]} {
    %c0 = arith.constant 0 : index
    %c0_0 = arith.constant 0 : index
    %0 = vector.load %arg5[%c0, %c0_0] : memref<128x1xf32, #tpu.memory_space<vmem>>, vector<128x1xf32>
    %c0_1 = arith.constant 0 : index
    %c0_2 = arith.constant 0 : index
    %1 = vector.load %arg3[%c0_1, %c0_2] : memref<128x512xf32, #tpu.memory_space<vmem>>, vector<128x512xf32>
    %2 = vector.broadcast %0 : vector<128x1xf32> to vector<128x512xf32>
    %3 = arith.mulf %2, %1 : vector<128x512xf32>
    %c0_3 = arith.constant 0 : index
    %c0_4 = arith.constant 0 : index
    %4 = vector.load %arg6[%c0_3, %c0_4] : memref<128x1xf32, #tpu.memory_space<vmem>>, vector<128x1xf32>
    %c0_5 = arith.constant 0 : index
    %c0_6 = arith.constant 0 : index
    %5 = vector.load %arg4[%c0_5, %c0_6] : memref<128x512xf32, #tpu.memory_space<vmem>>, vector<128x512xf32>
    %6 = vector.broadcast %4 : vector<128x1xf32> to vector<128x512xf32>
    %7 = arith.mulf %6, %5 : vector<128x512xf32>
    %8 = arith.addf %3, %7 : vector<128x512xf32>
    %c0_7 = arith.constant 0 : index
    %c0_8 = arith.constant 0 : index
    %9 = vector.load %arg2[%c0_7, %c0_8] : memref<8x128xf32, #tpu.memory_space<vmem>>, vector<8x128xf32>
    %cst = arith.constant dense<0.000000e+00> : vector<8x512xf32>
    %10 = tpu.matmul %9, %8, %cst {dimension_numbers = #tpu.dot_dimension_numbers<[1], [0], [0], [1], [0, 0, 1, 1], [], []>} : vector<8x128xf32>, vector<128x512xf32>, vector<8x512xf32> -> vector<8x512xf32>
    %c0_9 = arith.constant 0 : index
    %c0_10 = arith.constant 0 : index
    %11 = vector.load %arg7[%c0_9, %c0_10] : memref<1x512xf32, #tpu.memory_space<vmem>>, vector<1x512xf32>
    %12 = vector.broadcast %11 : vector<1x512xf32> to vector<8x512xf32>
    %13 = arith.addf %10, %12 : vector<8x512xf32>
    %c0_11 = arith.constant 0 : index
    %c0_12 = arith.constant 0 : index
    %14 = vector.load %arg8[%c0_11, %c0_12] : memref<8x512xf32, #tpu.memory_space<vmem>>, vector<8x512xf32>
    tpu.vector_store %arg8[%c0_11, %c0_12], %13 {strides = array<i32>} : memref<8x512xf32, #tpu.memory_space<vmem>>, vector<8x512xf32>,
    return
  }
  func.func @transform_0(%arg0: i32, %arg1: i32) -> (i32, i32) {
    %c0_i32 = arith.constant 0 : i32
    %c0_i32_0 = arith.constant 0 : i32
    return %arg1, %c0_i32 : i32, i32
  }
  func.func @transform_1(%arg0: i32, %arg1: i32) -> (i32, i32) {
    %c0_i32 = arith.constant 0 : i32
    %c0_i32_0 = arith.constant 0 : i32
    return %c0_i32, %arg0 : i32, i32
  }
  func.func @transform_2(%arg0: i32, %arg1: i32) -> (i32, i32) {
    %c0_i32 = arith.constant 0 : i32
    %c0_i32_0 = arith.constant 0 : i32
    return %c0_i32, %arg0 : i32, i32
  }
  func.func @transform_3(%arg0: i32, %arg1: i32) -> (i32, i32) {
    %c0_i32 = arith.constant 0 : i32
    %c0_i32_0 = arith.constant 0 : i32
    %c0_i32_1 = arith.constant 0 : i32
    return %c0_i32, %c0_i32_0 : i32, i32
  }
  func.func @transform_4(%arg0: i32, %arg1: i32) -> (i32, i32) {
    %c0_i32 = arith.constant 0 : i32
    %c0_i32_0 = arith.constant 0 : i32
    %c0_i32_1 = arith.constant 0 : i32
    return %c0_i32, %c0_i32_0 : i32, i32
  }
  func.func @transform_5(%arg0: i32, %arg1: i32) -> (i32, i32) {
    %c0_i32 = arith.constant 0 : i32
    %c0_i32_0 = arith.constant 0 : i32
    return %c0_i32, %arg0 : i32, i32
  }
  func.func @transform_6(%arg0: i32, %arg1: i32) -> (i32, i32) {
    %c0_i32 = arith.constant 0 : i32
    return %arg1, %arg0 : i32, i32
  }
}

</mosaic_0001>

<bundles_post_ra>
// kernel: combine_uv_forward.1
= control target key start
LH: loop header
LB: loop body
LE: loop exit
PB: predicated region body
PF: predicated region fallthrough
CT: control target
= control target key end

     0   :  { %v638_v0 = vmov 0   ;;  %s1196_s3 = inlined_call_operand.vmem [shape: f32[128,1], index: 3, kind: input, shape index: {}]   ;;  %s1197_s4 = inlined_call_operand.vmem [shape: f32[128,1], index: 4, kind: input, shape index: {}]   ;;  %s1198_s1 = inlined_call_operand.vmem [shape: f32[128,512], index: 1, kind: input, shape index: {}]   ;;  %s1199_s2 = inlined_call_operand.vmem [shape: f32[128,512], index: 2, kind: input, shape index: {}]   ;;  %s1200_s0 = inlined_call_operand.vmem [shape: f32[8,128], index: 0, kind: input, shape index: {}]   ;;  %s1201_s5 = inlined_call_operand.vmem [shape: f32[1,512], index: 5, kind: input, shape index: {}]   ;;  %s1202_s6 = inlined_call_operand.vmem [shape: f32[8,512], index: 6, kind: output, shape index: {}]  }
   0x1   :  { %637 = vset.pattern.permute.xlu2 %v638_v0  ;;  %636 = vset.pattern.permute.xlu1 %v638_v0  ;;  %v38_v1 = vld [vmem:[%s1196_s3 + $0x78] sm:$0xff]  ;;  %v37_v2 = vld [vmem:[%s1196_s3 + $0x70] sm:$0xff]  ;;  %v36_v3 = vld [vmem:[%s1196_s3 + $0x68] sm:$0xff] }
   0x2   :  { %635 = vset.pattern.permute.xlu0 %v638_v0  ;;  %175 = vperm.xlu1 %636, %v37_v2   ;;  %v261_v4 = vld [vmem:[%s1197_s4 + $0x70] sm:$0xff]  ;;  %v262_v5 = vld [vmem:[%s1197_s4 + $0x78] sm:$0xff]  ;;  %v260_v6 = vld [vmem:[%s1197_s4 + $0x68] sm:$0xff] }
   0x3   :  { %180 = vperm.xlu0 %635, %v38_v1   ;;  %170 = vperm.xlu2 %637, %v36_v3   ;;  %v259_v7 = vld [vmem:[%s1197_s4 + $0x60] sm:$0xff]  ;;  %v34_v9 = vld [vmem:[%s1196_s3 + $0x58] sm:$0xff]  ;;  %v33_v10 = vld [vmem:[%s1196_s3 + $0x50] sm:$0xff] }
   0x4   :  { %v35_v8 = vld [vmem:[%s1196_s3 + $0x60] sm:$0xff]  ;;  %v258_v11 = vld [vmem:[%s1197_s4 + $0x58] sm:$0xff]  ;;  %v257_v12 = vld [vmem:[%s1197_s4 + $0x50] sm:$0xff] }
   0x5   :  { %v256_v13 = vld [vmem:[%s1197_s4 + $0x48] sm:$0xff]  ;;  %v31_v15 = vld [vmem:[%s1196_s3 + $0x40] sm:$0xff]  ;;  %v30_v16 = vld [vmem:[%s1196_s3 + $0x38] sm:$0xff] }
   0x6   :  { %v32_v14 = vld [vmem:[%s1196_s3 + $0x48] sm:$0xff]  ;;  %v255_v17 = vld [vmem:[%s1197_s4 + $0x40] sm:$0xff]  ;;  %v254_v18 = vld [vmem:[%s1197_s4 + $0x38] sm:$0xff] }
   0x7   :  { %v253_v19 = vld [vmem:[%s1197_s4 + $0x30] sm:$0xff]  ;;  %v28_v21 = vld [vmem:[%s1196_s3 + $0x28] sm:$0xff]  ;;  %v27_v22 = vld [vmem:[%s1196_s3 + $0x20] sm:$0xff] }
   0x8   :  { %v29_v20 = vld [vmem:[%s1196_s3 + $0x30] sm:$0xff]  ;;  %v252_v23 = vld [vmem:[%s1197_s4 + $0x28] sm:$0xff]  ;;  %v251_v24 = vld [vmem:[%s1197_s4 + $0x20] sm:$0xff] }
   0x9   :  { %v250_v25 = vld [vmem:[%s1197_s4 + $0x18] sm:$0xff]  ;;  %v25_v27 = vld [vmem:[%s1196_s3 + $0x10] sm:$0xff]  ;;  %v24_v28 = vld [vmem:[%s1196_s3 + $0x8] sm:$0xff] }
   0xa   :  { %399 = vperm.xlu1 %636, %v261_v4   ;;  %v26_v26 = vld [vmem:[%s1196_s3 + $0x18] sm:$0xff]  ;;  %v249_v29 = vld [vmem:[%s1197_s4 + $0x10] sm:$0xff]  ;;  %v248_v30 = vld [vmem:[%s1197_s4 + $0x8] sm:$0xff] }
   0xb   :  { %404 = vperm.xlu0 %635, %v262_v5   ;;  %394 = vperm.xlu2 %637, %v260_v6   ;;  %v247_v31 = vld [vmem:[%s1197_s4] sm:$0xff]  ;;  %v100_v39 = vld [vmem:[%s1198_s1 + $0x1e8] sm:$0xff]  ;;  %v101_v43 = vld [vmem:[%s1198_s1 + $0x1f0] sm:$0xff] }
   0xc   :  { %v23_v32 = vld [vmem:[%s1196_s3] sm:$0xff]  ;;  %v92_v42 = vld [vmem:[%s1198_s1 + $0x1a8] sm:$0xff]  ;;  %v93_v45 = vld [vmem:[%s1198_s1 + $0x1b0] sm:$0xff] }
   0xd   :  { %v99_v38 = vld [vmem:[%s1198_s1 + $0x1e0] sm:$0xff]  ;;  %v316_v44 = vld [vmem:[%s1199_s2 + $0x1a8] sm:$0xff]  ;;  %v94_v46 = vld [vmem:[%s1198_s1 + $0x1b8] sm:$0xff] }
   0xe   :  { %v91_v40 = vld [vmem:[%s1198_s1 + $0x1a0] sm:$0xff]  ;;  %v102_v47 = vld [vmem:[%s1198_s1 + $0x1f8] sm:$0xff]  ;;  %v317_v48 = vld [vmem:[%s1199_s2 + $0x1b0] sm:$0xff] }
   0xf   :  { %v315_v41 = vld [vmem:[%s1199_s2 + $0x1a0] sm:$0xff]  ;;  %v318_v49 = vld [vmem:[%s1199_s2 + $0x1b8] sm:$0xff]  ;;  %v320_v53 = vld [vmem:[%s1199_s2 + $0x1c8] sm:$0xff] }
  0x10   :  { %v323_v50 = vld [vmem:[%s1199_s2 + $0x1e0] sm:$0xff]  ;;  %v324_v56 = vld [vmem:[%s1199_s2 + $0x1e8] sm:$0xff]  ;;  %v325_v57 = vld [vmem:[%s1199_s2 + $0x1f0] sm:$0xff] }
  0x11   :  { %v95_v51 = vld [vmem:[%s1198_s1 + $0x1c0] sm:$0xff]  ;;  %v326_v58 = vld [vmem:[%s1199_s2 + $0x1f8] sm:$0xff]  ;;  %v96_v2 = vld [vmem:[%s1198_s1 + $0x1c8] sm:$0xff] }
  0x12   :  { %389 = vperm.xlu1 %636, %v259_v7   ;;  %v319_v52 = vld [vmem:[%s1199_s2 + $0x1c0] sm:$0xff]  ;;  %v321_v3 = vld [vmem:[%s1199_s2 + $0x1d0] sm:$0xff]  ;;  %v322_v4 = vld [vmem:[%s1199_s2 + $0x1d8] sm:$0xff] }
  0x13   :  { %165 = vperm.xlu0 %635, %v35_v8   ;;  %160 = vperm.xlu2 %637, %v34_v9  }
  0x1a   :  { %155 = vperm.xlu1 %636, %v33_v10  }
  0x1b   :  { %384 = vperm.xlu0 %635, %v258_v11   ;;  %379 = vperm.xlu2 %637, %v257_v12  }
  0x22   :  { %374 = vperm.xlu1 %636, %v256_v13  }
  0x23   :  { %150 = vperm.xlu0 %635, %v32_v14   ;;  %145 = vperm.xlu2 %637, %v31_v15  }
  0x2a   :  { %140 = vperm.xlu1 %636, %v30_v16   ;;  %v97_v16 = vld [vmem:[%s1198_s1 + $0x1d0] sm:$0xff] }
  0x2b   :  { %369 = vperm.xlu0 %635, %v255_v17   ;;  %364 = vperm.xlu2 %637, %v254_v18   ;;  %v98_v17 = vld [vmem:[%s1198_s1 + $0x1d8] sm:$0xff] }
  0x32   :  { %359 = vperm.xlu1 %636, %v253_v19  }
  0x33   :  { %135 = vperm.xlu0 %635, %v29_v20   ;;  %130 = vperm.xlu2 %637, %v28_v21  }
  0x3a   :  { %125 = vperm.xlu1 %636, %v27_v22  }
  0x3b   :  { %354 = vperm.xlu0 %635, %v252_v23   ;;  %349 = vperm.xlu2 %637, %v251_v24  }
  0x42   :  { %344 = vperm.xlu1 %636, %v250_v25  }
  0x43   :  { %120 = vperm.xlu0 %635, %v26_v26   ;;  %115 = vperm.xlu2 %637, %v25_v27  }
  0x4a   :  { %110 = vperm.xlu1 %636, %v24_v28  }
  0x4b   :  { %339 = vperm.xlu0 %635, %v249_v29   ;;  %334 = vperm.xlu2 %637, %v248_v30  }
  0x52   :  { %329 = vperm.xlu1 %636, %v247_v31   ;;  %v311_v31 = vld [vmem:[%s1199_s2 + $0x180] sm:$0xff] }
  0x53   :  { %105 = vperm.xlu0 %635, %v23_v32   ;;  %v312_v32 = vld [vmem:[%s1199_s2 + $0x188] sm:$0xff] }
  0x5d   :  { %v171_v33 = vpop.permute.xlu2 %170 }
  0x5e   :  { %v235_v54 = vmul.f32 %v171_v33, %v91_v40  ;;  %v236_v55 = vmul.f32 %v171_v33, %v92_v42  ;;  %v237_v61 = vmul.f32 %v171_v33, %v93_v45  ;;  %v238_v62 = vmul.f32 %v171_v33, %v94_v46  ;;  %v313_v33 = vld [vmem:[%s1199_s2 + $0x190] sm:$0xff]  ;;  %v90_v45 = vld [vmem:[%s1198_s1 + $0x198] sm:$0xff] }
  0x5f   :  { %v89_v40 = vld [vmem:[%s1198_s1 + $0x190] sm:$0xff]  ;;  %v314_v46 = vld [vmem:[%s1199_s2 + $0x198] sm:$0xff] }
  0x65   :  { %v395_v34 = vpop.permute.xlu2 %394 }
  0x66   :  { %v459_v59 = vmul.f32 %v395_v34, %v315_v41  ;;  %v460_v60 = vmul.f32 %v395_v34, %v316_v44  ;;  %v461_v5 = vmul.f32 %v395_v34, %v317_v48  ;;  %v462_v6 = vmul.f32 %v395_v34, %v318_v49 }
  0x68   :  { %v524_v42 = vadd.f32 %v460_v60, %v236_v55  ;;  %v526_v44 = vadd.f32 %v462_v6, %v238_v62  ;;  %v85_v62 = vld [vmem:[%s1198_s1 + $0x170] sm:$0xff] }
  0x69   :  { %v309_v6 = vld [vmem:[%s1199_s2 + $0x170] sm:$0xff] }
  0x6d   :  { %v770_v37 = vpop.permute.xlu2 %160 }
  0x74   :  { %v176_v35 = vpop.permute.xlu1 %175 }
  0x75   :  { %v181_v36 = vpop.permute.xlu0 %180  ;;  %v239_v18 = vmul.f32 %v176_v35, %v95_v51  ;;  %v240_v19 = vmul.f32 %v176_v35, %v96_v2  ;;  %v844_v22 = vpop.permute.xlu2 %379  ;;  %v241_v27 = vmul.f32 %v176_v35, %v97_v16  ;;  %v242_v28 = vmul.f32 %v176_v35, %v98_v17  ;;  %v79_v2 = vld [vmem:[%s1198_s1 + $0x140] sm:$0xff] }
  0x76   :  { %v243_v0 = vmul.f32 %v181_v36, %v99_v38  ;;  %v244_v1 = vmul.f32 %v181_v36, %v100_v39  ;;  %v245_v8 = vmul.f32 %v181_v36, %v101_v43  ;;  %v246_v9 = vmul.f32 %v181_v36, %v102_v47  ;;  %v87_v38 = vld [vmem:[%s1198_s1 + $0x180] sm:$0xff]  ;;  %v88_v39 = vld [vmem:[%s1198_s1 + $0x188] sm:$0xff] }
  0x77   :  { %v523_v36 = vadd.f32 %v459_v59, %v235_v54  ;;  %v525_v43 = vadd.f32 %v461_v5, %v237_v61  ;;  %v83_v59 = vld [vmem:[%s1198_s1 + $0x160] sm:$0xff]  ;;  %v84_v61 = vld [vmem:[%s1198_s1 + $0x168] sm:$0xff] }
  0x78   :  { %v308_v5 = vld [vmem:[%s1199_s2 + $0x168] sm:$0xff] }
  0x7c   :  { %v400_v63 = vpop.permute.xlu1 %399 }
  0x7d   :  { %v405_v7 = vpop.permute.xlu0 %404  ;;  %v463_v10 = vmul.f32 %v400_v63, %v319_v52  ;;  %v464_v11 = vmul.f32 %v400_v63, %v320_v53  ;;  %v465_v20 = vmul.f32 %v400_v63, %v321_v3  ;;  %v466_v21 = vmul.f32 %v400_v63, %v322_v4  ;;  %v86_v63 = vld [vmem:[%s1198_s1 + $0x178] sm:$0xff]  ;;  %v303_v3 = vld [vmem:[%s1199_s2 + $0x140] sm:$0xff]  ;;  %v80_v4 = vld [vmem:[%s1198_s1 + $0x148] sm:$0xff] }
  0x7e   :  { %v467_v12 = vmul.f32 %v405_v7, %v323_v50  ;;  %v468_v13 = vmul.f32 %v405_v7, %v324_v56  ;;  %v469_v14 = vmul.f32 %v405_v7, %v325_v57  ;;  %v470_v15 = vmul.f32 %v405_v7, %v326_v58  ;;  %v310_v7 = vld [vmem:[%s1199_s2 + $0x178] sm:$0xff] }
  0x7f   :  { %v527_v29 = vadd.f32 %v463_v10, %v239_v18  ;;  %v528_v30 = vadd.f32 %v464_v11, %v240_v19  ;;  %v529_v34 = vadd.f32 %v465_v20, %v241_v27  ;;  %v530_v35 = vadd.f32 %v466_v21, %v242_v28  ;;  %v304_v11 = vld [vmem:[%s1199_s2 + $0x148] sm:$0xff] }
  0x80   :  { %v531_v23 = vadd.f32 %v467_v12, %v243_v0  ;;  %v532_v24 = vadd.f32 %v468_v13, %v244_v1  ;;  %v533_v25 = vadd.f32 %v469_v14, %v245_v8  ;;  %v534_v26 = vadd.f32 %v470_v15, %v246_v9  ;;  %v882_v0 = vpop.permute.xlu2 %145  ;;  %v307_v1 = vld [vmem:[%s1199_s2 + $0x160] sm:$0xff]  ;;  %v81_v12 = vld [vmem:[%s1198_s1 + $0x150] sm:$0xff]  ;;  %v82_v13 = vld [vmem:[%s1198_s1 + $0x158] sm:$0xff] }
  0x81   :  { %v227_v9 = vmul.f32 %v770_v37, %v83_v59  ;;  %v228_v10 = vmul.f32 %v770_v37, %v84_v61  ;;  %v229_v15 = vmul.f32 %v770_v37, %v85_v62  ;;  %v230_v16 = vmul.f32 %v770_v37, %v86_v63  ;;  %v71_v61 = vld [vmem:[%s1198_s1 + $0x100] sm:$0xff]  ;;  %v72_v63 = vld [vmem:[%s1198_s1 + $0x108] sm:$0xff] }
  0x82   :  { %546 = vmatpush.msra.mxu0 %v531_v23  ;;  %566 = vmatpush.msra.mxu1 %v532_v24  ;;  %v305_v24 = vld [vmem:[%s1199_s2 + $0x150] sm:$0xff]  ;;  %v448_v27 = vmul.f32 %v844_v22, %v304_v11  ;;  %v215_v11 = vmul.f32 %v882_v0, %v71_v61 }
  0x83   :  { %586 = vmatpush.msra.mxu2 %v533_v25  ;;  %606 = vmatpush.msra.mxu3 %v534_v26  ;;  %v306_v25 = vld [vmem:[%s1199_s2 + $0x158] sm:$0xff]  ;;  %v447_v26 = vmul.f32 %v844_v22, %v303_v3  ;;  %v295_v3 = vld [vmem:[%s1199_s2 + $0x100] sm:$0xff] }
  0x84   :  { %547 = vmatpush.msra.mxu0 %v527_v29  ;;  %567 = vmatpush.msra.mxu1 %v528_v30  ;;  %v390_v41 = vpop.permute.xlu1 %389 }
  0x85   :  { %587 = vmatpush.msra.mxu2 %v529_v34  ;;  %607 = vmatpush.msra.mxu3 %v530_v35  ;;  %v166_v47 = vpop.permute.xlu0 %165  ;;  %v455_v48 = vmul.f32 %v390_v41, %v311_v31  ;;  %v456_v49 = vmul.f32 %v390_v41, %v312_v32  ;;  %v457_v50 = vmul.f32 %v390_v41, %v313_v33  ;;  %v75_v35 = vld [vmem:[%s1198_s1 + $0x120] sm:$0xff] }
  0x86   :  { %548 = vmatpush.msra.mxu0 %v523_v36  ;;  %568 = vmatpush.msra.mxu1 %v524_v42  ;;  %v231_v51 = vmul.f32 %v166_v47, %v87_v38  ;;  %v232_v52 = vmul.f32 %v166_v47, %v88_v39  ;;  %v233_v53 = vmul.f32 %v166_v47, %v89_v40  ;;  %v299_v39 = vld [vmem:[%s1199_s2 + $0x120] sm:$0xff]  ;;  %v300_v40 = vld [vmem:[%s1199_s2 + $0x128] sm:$0xff] }
  0x87   :  { %588 = vmatpush.msra.mxu2 %v525_v43  ;;  %608 = vmatpush.msra.mxu3 %v526_v44  ;;  %v234_v54 = vmul.f32 %v166_v47, %v90_v45  ;;  %v458_v55 = vmul.f32 %v390_v41, %v314_v46  ;;  %v449_v33 = vmul.f32 %v844_v22, %v305_v24  ;;  %v76_v43 = vld [vmem:[%s1198_s1 + $0x128] sm:$0xff]  ;;  %v77_v44 = vld [vmem:[%s1198_s1 + $0x130] sm:$0xff]  ;;  %v78_v45 = vld [vmem:[%s1198_s1 + $0x138] sm:$0xff] }
  0x88   :  { %v519_v56 = vadd.f32 %v455_v48, %v231_v51  ;;  %v520_v57 = vadd.f32 %v456_v49, %v232_v52  ;;  %v521_v58 = vadd.f32 %v457_v50, %v233_v53  ;;  %v450_v34 = vmul.f32 %v844_v22, %v306_v25  ;;  %v301_v22 = vld [vmem:[%s1199_s2 + $0x130] sm:$0xff]  ;;  %v365_v46 = vpop.permute.xlu2 %364  ;;  %v302_v48 = vld [vmem:[%s1199_s2 + $0x138] sm:$0xff] }
  0x89   :  { %v522_v60 = vadd.f32 %v458_v55, %v234_v54 }
  0x8a   :  { %549 = vmatpush.msra.mxu0 %v519_v56  ;;  %569 = vmatpush.msra.mxu1 %v520_v57 }
  0x8b   :  { %589 = vmatpush.msra.mxu2 %v521_v58  ;;  %609 = vmatpush.msra.mxu3 %v522_v60 }
  0x8c   :  { %v156_v8 = vpop.permute.xlu1 %155 }
  0x8d   :  { %v385_v14 = vpop.permute.xlu0 %384  ;;  %v223_v17 = vmul.f32 %v156_v8, %v79_v2  ;;  %v224_v18 = vmul.f32 %v156_v8, %v80_v4  ;;  %v225_v28 = vmul.f32 %v156_v8, %v81_v12  ;;  %v226_v37 = vmul.f32 %v156_v8, %v82_v13  ;;  %v74_v2 = vld [vmem:[%s1198_s1 + $0x118] sm:$0xff]  ;;  %v67_v4 = vld [vmem:[%s1198_s1 + $0xe0] sm:$0xff]  ;;  %v297_v8 = vld [vmem:[%s1199_s2 + $0x110] sm:$0xff] }
  0x8e   :  { %v451_v19 = vmul.f32 %v385_v14, %v307_v1  ;;  %v452_v20 = vmul.f32 %v385_v14, %v308_v5  ;;  %v453_v21 = vmul.f32 %v385_v14, %v309_v6  ;;  %v454_v23 = vmul.f32 %v385_v14, %v310_v7  ;;  %v73_v1 = vld [vmem:[%s1198_s1 + $0x110] sm:$0xff]  ;;  %v291_v5 = vld [vmem:[%s1199_s2 + $0xe0] sm:$0xff]  ;;  %v68_v6 = vld [vmem:[%s1198_s1 + $0xe8] sm:$0xff] }
  0x8f   :  { %v511_v36 = vadd.f32 %v447_v26, %v223_v17  ;;  %v512_v38 = vadd.f32 %v448_v27, %v224_v18  ;;  %v513_v41 = vadd.f32 %v449_v33, %v225_v28  ;;  %v514_v42 = vadd.f32 %v450_v34, %v226_v37  ;;  %v296_v7 = vld [vmem:[%s1199_s2 + $0x108] sm:$0xff]  ;;  %v69_v14 = vld [vmem:[%s1198_s1 + $0xf0] sm:$0xff]  ;;  %v294_v28 = vld [vmem:[%s1199_s2 + $0xf8] sm:$0xff] }
  0x90   :  { %v515_v29 = vadd.f32 %v451_v19, %v227_v9  ;;  %v516_v30 = vadd.f32 %v452_v20, %v228_v10  ;;  %v517_v31 = vadd.f32 %v453_v21, %v229_v15  ;;  %v518_v32 = vadd.f32 %v454_v23, %v230_v16  ;;  %v298_v9 = vld [vmem:[%s1199_s2 + $0x118] sm:$0xff]  ;;  %v292_v13 = vld [vmem:[%s1199_s2 + $0xe8] sm:$0xff]  ;;  %v998_v21 = vpop.permute.xlu2 %130  ;;  %v293_v27 = vld [vmem:[%s1199_s2 + $0xf0] sm:$0xff] }
  0x91   :  { %v216_v12 = vmul.f32 %v882_v0, %v72_v63  ;;  %v70_v15 = vld [vmem:[%s1198_s1 + $0xf8] sm:$0xff]  ;;  %v217_v17 = vmul.f32 %v882_v0, %v73_v1  ;;  %v218_v18 = vmul.f32 %v882_v0, %v74_v2  ;;  %v435_v37 = vmul.f32 %v365_v46, %v291_v5  ;;  %v59_v63 = vld [vmem:[%s1198_s1 + $0xa0] sm:$0xff]  ;;  %v60_v2 = vld [vmem:[%s1198_s1 + $0xa8] sm:$0xff] }
  0x92   :  { %550 = vmatpush.msra.mxu0 %v515_v29  ;;  %570 = vmatpush.msra.mxu1 %v516_v30  ;;  %v436_v29 = vmul.f32 %v365_v46, %v292_v13  ;;  %v283_v5 = vld [vmem:[%s1199_s2 + $0xa0] sm:$0xff]  ;;  %v203_v13 = vmul.f32 %v998_v21, %v59_v63 }
  0x93   :  { %590 = vmatpush.msra.mxu2 %v517_v31  ;;  %610 = vmatpush.msra.mxu3 %v518_v32 }
  0x94   :  { %551 = vmatpush.msra.mxu0 %v511_v36  ;;  %571 = vmatpush.msra.mxu1 %v512_v38  ;;  %v375_v47 = vpop.permute.xlu1 %374  ;;  %v438_v36 = vmul.f32 %v365_v46, %v294_v28  ;;  %v63_v38 = vld [vmem:[%s1198_s1 + $0xc0] sm:$0xff] }
  0x95   :  { %591 = vmatpush.msra.mxu2 %v513_v41  ;;  %611 = vmatpush.msra.mxu3 %v514_v42  ;;  %v151_v49 = vpop.permute.xlu0 %150  ;;  %v443_v50 = vmul.f32 %v375_v47, %v299_v39  ;;  %v444_v51 = vmul.f32 %v375_v47, %v300_v40  ;;  %v445_v52 = vmul.f32 %v375_v47, %v301_v22  ;;  %v287_v22 = vld [vmem:[%s1199_s2 + $0xc0] sm:$0xff]  ;;  %v288_v41 = vld [vmem:[%s1199_s2 + $0xc8] sm:$0xff]  ;;  %v289_v42 = vld [vmem:[%s1199_s2 + $0xd0] sm:$0xff] }
  0x96   :  { %v219_v53 = vmul.f32 %v151_v49, %v75_v35  ;;  %v220_v54 = vmul.f32 %v151_v49, %v76_v43  ;;  %v221_v55 = vmul.f32 %v151_v49, %v77_v44  ;;  %v222_v56 = vmul.f32 %v151_v49, %v78_v45  ;;  %v64_v45 = vld [vmem:[%s1198_s1 + $0xc8] sm:$0xff]  ;;  %v290_v49 = vld [vmem:[%s1199_s2 + $0xd8] sm:$0xff] }
  0x97   :  { %v446_v57 = vmul.f32 %v375_v47, %v302_v48  ;;  %v437_v35 = vmul.f32 %v365_v46, %v293_v27  ;;  %v65_v46 = vld [vmem:[%s1198_s1 + $0xd0] sm:$0xff]  ;;  %v66_v47 = vld [vmem:[%s1198_s1 + $0xd8] sm:$0xff] }
  0x98   :  { %v507_v58 = vadd.f32 %v443_v50, %v219_v53  ;;  %v508_v59 = vadd.f32 %v444_v51, %v220_v54  ;;  %v509_v60 = vadd.f32 %v445_v52, %v221_v55 }
  0x99   :  { %v510_v62 = vadd.f32 %v446_v57, %v222_v56 }
  0x9a   :  { %552 = vmatpush.msra.mxu0 %v507_v58  ;;  %572 = vmatpush.msra.mxu1 %v508_v59  ;;  %v350_v59 = vpop.permute.xlu2 %349 }
  0x9b   :  { %592 = vmatpush.msra.mxu2 %v509_v60  ;;  %612 = vmatpush.msra.mxu3 %v510_v62 }
  0x9c   :  { %v141_v10 = vpop.permute.xlu1 %140 }
  0x9d   :  { %v370_v16 = vpop.permute.xlu0 %369  ;;  %v211_v19 = vmul.f32 %v141_v10, %v67_v4  ;;  %v212_v20 = vmul.f32 %v141_v10, %v68_v6  ;;  %v213_v30 = vmul.f32 %v141_v10, %v69_v14  ;;  %v214_v0 = vmul.f32 %v141_v10, %v70_v15  ;;  %v62_v4 = vld [vmem:[%s1198_s1 + $0xb8] sm:$0xff]  ;;  %v55_v6 = vld [vmem:[%s1198_s1 + $0x80] sm:$0xff]  ;;  %v285_v10 = vld [vmem:[%s1199_s2 + $0xb0] sm:$0xff] }
  0x9e   :  { %v439_v23 = vmul.f32 %v370_v16, %v295_v3  ;;  %v440_v24 = vmul.f32 %v370_v16, %v296_v7  ;;  %v441_v25 = vmul.f32 %v370_v16, %v297_v8  ;;  %v442_v26 = vmul.f32 %v370_v16, %v298_v9  ;;  %v61_v3 = vld [vmem:[%s1198_s1 + $0xb0] sm:$0xff]  ;;  %v279_v7 = vld [vmem:[%s1199_s2 + $0x80] sm:$0xff]  ;;  %v56_v8 = vld [vmem:[%s1198_s1 + $0x88] sm:$0xff] }
  0x9f   :  { %v499_v39 = vadd.f32 %v435_v37, %v211_v19  ;;  %v500_v40 = vadd.f32 %v436_v29, %v212_v20  ;;  %v501_v43 = vadd.f32 %v437_v35, %v213_v30  ;;  %v502_v44 = vadd.f32 %v438_v36, %v214_v0  ;;  %v284_v9 = vld [vmem:[%s1199_s2 + $0xa8] sm:$0xff]  ;;  %v57_v16 = vld [vmem:[%s1198_s1 + $0x90] sm:$0xff]  ;;  %v282_v29 = vld [vmem:[%s1199_s2 + $0x98] sm:$0xff] }
  0xa0   :  { %v503_v31 = vadd.f32 %v439_v23, %v215_v11  ;;  %v504_v32 = vadd.f32 %v440_v24, %v216_v12  ;;  %v505_v33 = vadd.f32 %v441_v25, %v217_v17  ;;  %v506_v34 = vadd.f32 %v442_v26, %v218_v18  ;;  %v286_v11 = vld [vmem:[%s1199_s2 + $0xb8] sm:$0xff]  ;;  %v280_v15 = vld [vmem:[%s1199_s2 + $0x88] sm:$0xff]  ;;  %v281_v37 = vld [vmem:[%s1199_s2 + $0x90] sm:$0xff] }
  0xa1   :  { %v204_v14 = vmul.f32 %v998_v21, %v60_v2  ;;  %v58_v17 = vld [vmem:[%s1198_s1 + $0x98] sm:$0xff]  ;;  %v205_v19 = vmul.f32 %v998_v21, %v61_v3  ;;  %v206_v20 = vmul.f32 %v998_v21, %v62_v4  ;;  %v423_v30 = vmul.f32 %v350_v59, %v279_v7  ;;  %v48_v3 = vld [vmem:[%s1198_s1 + $0x48] sm:$0xff]  ;;  %v49_v4 = vld [vmem:[%s1198_s1 + $0x50] sm:$0xff] }
  0xa2   :  { %553 = vmatpush.msra.mxu0 %v503_v31  ;;  %573 = vmatpush.msra.mxu1 %v504_v32  ;;  %v424_v0 = vmul.f32 %v350_v59, %v280_v15  ;;  %v425_v36 = vmul.f32 %v350_v59, %v281_v37  ;;  %v43_v7 = vld [vmem:[%s1198_s1 + $0x20] sm:$0xff] }
  0xa3   :  { %593 = vmatpush.msra.mxu2 %v505_v33  ;;  %613 = vmatpush.msra.mxu3 %v506_v34 }
  0xa4   :  { %554 = vmatpush.msra.mxu0 %v499_v39  ;;  %574 = vmatpush.msra.mxu1 %v500_v40  ;;  %v360_v48 = vpop.permute.xlu1 %359  ;;  %v51_v39 = vld [vmem:[%s1198_s1 + $0x60] sm:$0xff]  ;;  %v116_v40 = vpop.permute.xlu2 %115 }
  0xa5   :  { %594 = vmatpush.msra.mxu2 %v501_v43  ;;  %614 = vmatpush.msra.mxu3 %v502_v44  ;;  %v136_v50 = vpop.permute.xlu0 %135  ;;  %v431_v51 = vmul.f32 %v360_v48, %v287_v22  ;;  %v432_v52 = vmul.f32 %v360_v48, %v288_v41  ;;  %v433_v53 = vmul.f32 %v360_v48, %v289_v42  ;;  %v275_v42 = vld [vmem:[%s1199_s2 + $0x60] sm:$0xff]  ;;  %v276_v43 = vld [vmem:[%s1199_s2 + $0x68] sm:$0xff]  ;;  %v277_v44 = vld [vmem:[%s1199_s2 + $0x70] sm:$0xff] }
  0xa6   :  { %v207_v54 = vmul.f32 %v136_v50, %v63_v38  ;;  %v208_v55 = vmul.f32 %v136_v50, %v64_v45  ;;  %v209_v56 = vmul.f32 %v136_v50, %v65_v46  ;;  %v210_v57 = vmul.f32 %v136_v50, %v66_v47  ;;  %v52_v47 = vld [vmem:[%s1198_s1 + $0x68] sm:$0xff] }
  0xa7   :  { %v434_v58 = vmul.f32 %v360_v48, %v290_v49  ;;  %v426_v38 = vmul.f32 %v350_v59, %v282_v29  ;;  %v53_v48 = vld [vmem:[%s1198_s1 + $0x70] sm:$0xff]  ;;  %v54_v49 = vld [vmem:[%s1198_s1 + $0x78] sm:$0xff] }
  0xa8   :  { %v495_v60 = vadd.f32 %v431_v51, %v207_v54  ;;  %v496_v61 = vadd.f32 %v432_v52, %v208_v55  ;;  %v497_v62 = vadd.f32 %v433_v53, %v209_v56  ;;  %v278_v51 = vld [vmem:[%s1199_s2 + $0x78] sm:$0xff] }
  0xa9   :  { %v498_v1 = vadd.f32 %v434_v58, %v210_v57 }
  0xaa   :  { %555 = vmatpush.msra.mxu0 %v495_v60  ;;  %575 = vmatpush.msra.mxu1 %v496_v61 }
  0xab   :  { %595 = vmatpush.msra.mxu2 %v497_v62  ;;  %615 = vmatpush.msra.mxu3 %v498_v1  ;;  %v47_v1 = vld [vmem:[%s1198_s1 + $0x40] sm:$0xff] }
  0xac   :  { %v126_v12 = vpop.permute.xlu1 %125  ;;  %v191_v15 = vmul.f32 %v116_v40, %v47_v1 }
  0xad   :  { %v355_v18 = vpop.permute.xlu0 %354  ;;  %v199_v23 = vmul.f32 %v126_v12, %v55_v6  ;;  %v200_v24 = vmul.f32 %v126_v12, %v56_v8  ;;  %v201_v31 = vmul.f32 %v126_v12, %v57_v16  ;;  %v202_v32 = vmul.f32 %v126_v12, %v58_v17  ;;  %v271_v6 = vld [vmem:[%s1199_s2 + $0x40] sm:$0xff]  ;;  %v274_v12 = vld [vmem:[%s1199_s2 + $0x58] sm:$0xff]  ;;  %v268_v17 = vld [vmem:[%s1199_s2 + $0x28] sm:$0xff] }
  0xae   :  { %v427_v25 = vmul.f32 %v355_v18, %v283_v5  ;;  %v428_v26 = vmul.f32 %v355_v18, %v284_v9  ;;  %v429_v27 = vmul.f32 %v355_v18, %v285_v10  ;;  %v430_v28 = vmul.f32 %v355_v18, %v286_v11  ;;  %v50_v5 = vld [vmem:[%s1198_s1 + $0x58] sm:$0xff]  ;;  %v267_v8 = vld [vmem:[%s1199_s2 + $0x20] sm:$0xff]  ;;  %v44_v9 = vld [vmem:[%s1198_s1 + $0x28] sm:$0xff] }
  0xaf   :  { %v487_v22 = vadd.f32 %v423_v30, %v199_v23  ;;  %v488_v41 = vadd.f32 %v424_v0, %v200_v24  ;;  %v489_v45 = vadd.f32 %v425_v36, %v201_v31  ;;  %v490_v46 = vadd.f32 %v426_v38, %v202_v32  ;;  %v272_v10 = vld [vmem:[%s1199_s2 + $0x48] sm:$0xff]  ;;  %v273_v11 = vld [vmem:[%s1199_s2 + $0x50] sm:$0xff]  ;;  %v270_v0 = vld [vmem:[%s1199_s2 + $0x38] sm:$0xff] }
  0xb0   :  { %v491_v33 = vadd.f32 %v427_v25, %v203_v13  ;;  %v492_v21 = vadd.f32 %v428_v26, %v204_v14  ;;  %v493_v34 = vadd.f32 %v429_v27, %v205_v19  ;;  %v494_v35 = vadd.f32 %v430_v28, %v206_v20  ;;  %v335_v13 = vpop.permute.xlu2 %334  ;;  %v45_v18 = vld [vmem:[%s1198_s1 + $0x30] sm:$0xff]  ;;  %v46_v19 = vld [vmem:[%s1198_s1 + $0x38] sm:$0xff] }
  0xb1   :  { %v192_v16 = vmul.f32 %v116_v40, %v48_v3  ;;  %v193_v23 = vmul.f32 %v116_v40, %v49_v4  ;;  %v194_v24 = vmul.f32 %v116_v40, %v50_v5  ;;  %v269_v30 = vld [vmem:[%s1199_s2 + $0x30] sm:$0xff]  ;;  %v411_v31 = vmul.f32 %v335_v13, %v267_v8  ;;  %v535_v3 = vld [vmem:[%s1200_s0] sm:$0xff] }
  0xb2   :  { %556 = vmatpush.msra.mxu0 %v491_v33  ;;  %576 = vmatpush.msra.mxu1 %v492_v21  ;;  %v412_v32 = vmul.f32 %v335_v13, %v268_v17  ;;  %v414_v40 = vmul.f32 %v335_v13, %v270_v0  ;;  %v536_v4 = vld [vmem:[%s1201_s5] sm:$0xf] }
  0xb3   :  { %596 = vmatpush.msra.mxu2 %v493_v34  ;;  %616 = vmatpush.msra.mxu3 %v494_v35  ;;  %v538_v5 = vperm.slane %v536_v4, 0 }
  0xb4   :  { %557 = vmatpush.msra.mxu0 %v487_v22  ;;  %577 = vmatpush.msra.mxu1 %v488_v41  ;;  %v345_v50 = vpop.permute.xlu1 %344  ;;  %v39_v22 = vld [vmem:[%s1198_s1] sm:$0xff] }
  0xb5   :  { %597 = vmatpush.msra.mxu2 %v489_v45  ;;  %617 = vmatpush.msra.mxu3 %v490_v46  ;;  %v121_v52 = vpop.permute.xlu0 %120  ;;  %v419_v53 = vmul.f32 %v345_v50, %v275_v42  ;;  %v420_v54 = vmul.f32 %v345_v50, %v276_v43  ;;  %v421_v55 = vmul.f32 %v345_v50, %v277_v44  ;;  %v263_v43 = vld [vmem:[%s1199_s2] sm:$0xff]  ;;  %v264_v44 = vld [vmem:[%s1199_s2 + $0x8] sm:$0xff]  ;;  %v265_v45 = vld [vmem:[%s1199_s2 + $0x10] sm:$0xff] }
  0xb6   :  { %v195_v56 = vmul.f32 %v121_v52, %v51_v39  ;;  %v196_v57 = vmul.f32 %v121_v52, %v52_v47  ;;  %v197_v58 = vmul.f32 %v121_v52, %v53_v48  ;;  %v198_v59 = vmul.f32 %v121_v52, %v54_v49  ;;  %v40_v48 = vld [vmem:[%s1198_s1 + $0x8] sm:$0xff]  ;;  %v41_v49 = vld [vmem:[%s1198_s1 + $0x10] sm:$0xff]  ;;  %v266_v52 = vld [vmem:[%s1199_s2 + $0x18] sm:$0xff] }
  0xb7   :  { %v422_v60 = vmul.f32 %v345_v50, %v278_v51  ;;  %v413_v39 = vmul.f32 %v335_v13, %v269_v30  ;;  %v42_v50 = vld [vmem:[%s1198_s1 + $0x18] sm:$0xff] }
  0xb8   :  { %v483_v61 = vadd.f32 %v419_v53, %v195_v56  ;;  %v484_v62 = vadd.f32 %v420_v54, %v196_v57  ;;  %v485_v63 = vadd.f32 %v421_v55, %v197_v58 }
  0xb9   :  { %v486_v2 = vadd.f32 %v422_v60, %v198_v59 }
  0xba   :  { %558 = vmatpush.msra.mxu0 %v483_v61  ;;  %578 = vmatpush.msra.mxu1 %v484_v62 }
  0xbb   :  { %598 = vmatpush.msra.mxu2 %v485_v63  ;;  %618 = vmatpush.msra.mxu3 %v486_v2 }
  0xbc   :  { %v111_v14 = vpop.permute.xlu1 %110 }
  0xbd   :  { %v340_v20 = vpop.permute.xlu0 %339  ;;  %v187_v25 = vmul.f32 %v111_v14, %v43_v7  ;;  %v188_v26 = vmul.f32 %v111_v14, %v44_v9  ;;  %v189_v33 = vmul.f32 %v111_v14, %v45_v18  ;;  %v190_v21 = vmul.f32 %v111_v14, %v46_v19 }
  0xbe   :  { %v415_v27 = vmul.f32 %v340_v20, %v271_v6  ;;  %v416_v28 = vmul.f32 %v340_v20, %v272_v10  ;;  %v417_v37 = vmul.f32 %v340_v20, %v273_v11  ;;  %v418_v29 = vmul.f32 %v340_v20, %v274_v12 }
  0xbf   :  { %v475_v41 = vadd.f32 %v411_v31, %v187_v25  ;;  %v476_v42 = vadd.f32 %v412_v32, %v188_v26  ;;  %v477_v46 = vadd.f32 %v413_v39, %v189_v33  ;;  %v478_v47 = vadd.f32 %v414_v40, %v190_v21 }
  0xc0   :  { %v479_v34 = vadd.f32 %v415_v27, %v191_v15  ;;  %v480_v35 = vadd.f32 %v416_v28, %v192_v16  ;;  %v481_v36 = vadd.f32 %v417_v37, %v193_v23  ;;  %v482_v38 = vadd.f32 %v418_v29, %v194_v24 }
  0xc1   :  { %v539_v6 = vperm.slane %v536_v4, 1  ;;  %v540_v11 = vperm.slane %v536_v4, 2  ;;  %v541_v12 = vperm.slane %v536_v4, 3 }
  0xc2   :  { %559 = vmatpush.msra.mxu0 %v479_v34  ;;  %579 = vmatpush.msra.mxu1 %v480_v35 }
  0xc3   :  { %599 = vmatpush.msra.mxu2 %v481_v36  ;;  %619 = vmatpush.msra.mxu3 %v482_v38 }
  0xc4   :  { %560 = vmatpush.msra.mxu0 %v475_v41  ;;  %580 = vmatpush.msra.mxu1 %v476_v42  ;;  %v330_v51 = vpop.permute.xlu1 %329 }
  0xc5   :  { %600 = vmatpush.msra.mxu2 %v477_v46  ;;  %620 = vmatpush.msra.mxu3 %v478_v47  ;;  %v106_v53 = vpop.permute.xlu0 %105  ;;  %v407_v54 = vmul.f32 %v330_v51, %v263_v43  ;;  %v408_v55 = vmul.f32 %v330_v51, %v264_v44  ;;  %v409_v56 = vmul.f32 %v330_v51, %v265_v45 }
  0xc6   :  { %v183_v57 = vmul.f32 %v106_v53, %v39_v22  ;;  %v184_v58 = vmul.f32 %v106_v53, %v40_v48  ;;  %v185_v59 = vmul.f32 %v106_v53, %v41_v49  ;;  %v186_v60 = vmul.f32 %v106_v53, %v42_v50 }
  0xc7   :  { %v410_v61 = vmul.f32 %v330_v51, %v266_v52 }
  0xc8   :  { %v471_v62 = vadd.f32 %v407_v54, %v183_v57  ;;  %v472_v63 = vadd.f32 %v408_v55, %v184_v58  ;;  %v473_v1 = vadd.f32 %v409_v56, %v185_v59 }
  0xc9   :  { %v474_v2 = vadd.f32 %v410_v61, %v186_v60 }
  0xca   :  { %561 = vmatpush.msra.mxu0 %v471_v62  ;;  %581 = vmatpush.msra.mxu1 %v472_v63 }
  0xcb   :  { %601 = vmatpush.msra.mxu2 %v473_v1  ;;  %621 = vmatpush.msra.mxu3 %v474_v2 }
  0xcc   :  { %602 = vmatmul.f32.vlgmr.msra.gmra.mxu2 %v535_v3  ;;  %622 = vmatmul.f32.vlgmr.msra.gmra.mxu3 %v535_v3 }
  0xcd   :  { %562 = vmatmul.f32.vlgmr.msra.gmra.mxu0 %v535_v3  ;;  %582 = vmatmul.f32.vlgmr.msra.gmra.mxu1 %v535_v3 }
 0x14a   :  { %v563_v7 = vpop.f32.mrf.mxu0  ;;  %v583_v8 = vpop.f32.mrf.mxu1 }
 0x14b   :  { %v564_v9 = vadd.f32 %v563_v7, %v538_v5  ;;  %v584_v10 = vadd.f32 %v583_v8, %v539_v6 }
 0x14d   :  { %626 = vst [vmem:[%s1202_s6] sm:$0xff] %v564_v9 }
 0x14e   :  { %627 = vst [vmem:[%s1202_s6 + $0x8] sm:$0xff] %v584_v10 }
 0x14f   :  { %v603_v13 = vpop.f32.mrf.mxu2  ;;  %v623_v14 = vpop.f32.mrf.mxu3 }
 0x150   :  { %v604_v15 = vadd.f32 %v603_v13, %v540_v11  ;;  %v624_v16 = vadd.f32 %v623_v14, %v541_v12 }
 0x152   :  { %628 = vst [vmem:[%s1202_s6 + $0x10] sm:$0xff] %v604_v15 }
 0x153   :  { %629 = vst [vmem:[%s1202_s6 + $0x18] sm:$0xff] %v624_v16 }

</bundles_post_ra>
